<compile_context>
chip_gen: v5e
topology: v5e:2x2
jax: 0.10.0
libtpu: 0.0.40
codegen_flags: <defaults>
</compile_context>

<pallas_src>
import jax
import jax.numpy as jnp
from jax.experimental import pallas as pl
from jax.experimental.pallas import tpu as pltpu

LANE = 128  # TPU vreg lane width


def _round_up(x, m):
    return (x + m - 1) // m * m


def value_network_kernel(s_ref, a_ref, w1s_ref, w1a_ref, b1_ref,
                         w2_ref, b2_ref, w3_ref, b3_ref, o_ref):
    # linear1 with the concat folded in as two partial matmuls, + ReLU (f32 VPU)
    h1 = (jnp.dot(s_ref[...], w1s_ref[...], preferred_element_type=jnp.float32)
          + jnp.dot(a_ref[...], w1a_ref[...], preferred_element_type=jnp.float32)
          + b1_ref[...])
    h1 = jnp.maximum(h1, 0.0)

    # linear2 + ReLU
    h2 = jnp.dot(h1, w2_ref[...], preferred_element_type=jnp.float32) + b2_ref[...]
    h2 = jnp.maximum(h2, 0.0)

    # linear3: H -> 1. Multiply + row-reduce on VPU/XLU instead of a 1-wide MXU
    # matmul. w3 is passed as a (1, H_pad) row; padded columns are zero.
    val = jnp.sum(h2 * w3_ref[...], axis=-1, keepdims=True) + b3_ref[...]  # (bm, 1)

    # Lane-dense writeback: broadcast the scalar column across 128 lanes.
    o_ref[...] = jnp.broadcast_to(val, o_ref.shape).astype(o_ref.dtype)


def value_network_forward(state, action, padded_params, *, batch_block=512):
    """state: (B, num_inputs), action: (B, num_actions) -> (B, 1)."""
    w1s, w1a, b1, w2, b2, w3, b3 = padded_params
    B, num_inputs = state.shape
    num_actions = action.shape[1]
    H_pad = w1s.shape[1]

    # Batch tile: full array for small B, 512-row blocks (sublane multiple,
    # tiny in VMEM even on v7x's 64 MiB) for realistic DDPG batches.
    bm = B if B <= batch_block else batch_block
    nb = pl.cdiv(B, bm)

    rep = lambda shape: pl.BlockSpec(shape, lambda i: (0, 0))  # replicated weights

    out_padded = pl.pallas_call(
        value_network_kernel,
        out_shape=jax.ShapeDtypeStruct((B, LANE), jnp.float32),
        grid=(nb,),
        in_specs=[
            pl.BlockSpec((bm, num_inputs), lambda i: (i, 0)),   # state
            pl.BlockSpec((bm, num_actions), lambda i: (i, 0)),  # action
            rep((num_inputs, H_pad)),                           # w1_state
            rep((num_actions, H_pad)),                          # w1_action
            rep((1, H_pad)),                                    # b1
            rep((H_pad, H_pad)),                                # w2
            rep((1, H_pad)),                                    # b2
            rep((1, H_pad)),                                    # w3 (row)
            rep((1, 1)),                                        # b3
        ],
        out_specs=pl.BlockSpec((bm, LANE), lambda i: (i, 0)),
        compiler_params=pltpu.CompilerParams(
            dimension_semantics=("parallel",)),  # shard batch across TCs (v7x)
    )(state, action, w1s, w1a, b1, w2, b2, w3, b3)

    # Lane-dense kernel output -> (B, 1) view expected by the module.
    return out_padded[:, :1]


def init_params(key, num_inputs, num_actions, hidden_size, init_w=0.003):
    """PyTorch-equivalent init. Weights stored transposed: (in_features, out)."""
    d_in = num_inputs + num_actions
    k1, k2, k3, k4, k5, k6 = jax.random.split(key, 6)

    def uniform(k, shape, bound):
        return jax.random.uniform(k, shape, jnp.float32, -bound, bound)

    bound1 = 1.0 / jnp.sqrt(d_in)
    bound2 = 1.0 / jnp.sqrt(hidden_size)
    w1 = uniform(k1, (d_in, hidden_size), bound1)
    b1 = uniform(k2, (1, hidden_size), bound1)
    w2 = uniform(k3, (hidden_size, hidden_size), bound2)
    b2 = uniform(k4, (1, hidden_size), bound2)
    w3 = uniform(k5, (hidden_size, 1), init_w)   # linear3 .uniform_(-init_w, init_w)
    b3 = uniform(k6, (1, 1), init_w)
    return (w1, b1, w2, b2, w3, b3)


def pad_params(params, num_inputs, num_actions, hidden_size):
    """One-time padding of the hidden dim to the 128-lane width; splits w1 so
    the concat can be folded into the kernel. Zero padding is exact: padded
    hidden units stay 0 through ReLU and contribute 0 to linear3."""
    w1, b1, w2, b2, w3, b3 = params
    H_pad = _round_up(hidden_size, LANE)
    pad_h = H_pad - hidden_size

    pad_cols = lambda a: jnp.pad(a, ((0, 0), (0, H_pad - a.shape[1])))

    w1s = pad_cols(w1[:num_inputs])                 # (num_inputs, H_pad)
    w1a = pad_cols(w1[num_inputs:])                 # (num_actions, H_pad)
    b1p = pad_cols(b1)                              # (1, H_pad)
    w2p = jnp.pad(w2, ((0, pad_h), (0, pad_h)))     # (H_pad, H_pad)
    b2p = pad_cols(b2)                              # (1, H_pad)
    w3p = pad_cols(w3.T)                            # (1, H_pad) row vector
    b3p = b3.reshape(1, 1)                          # (1, 1)
    return (w1s, w1a, b1p, w2p, b2p, w3p, b3p)


def reference_forward(state, action, params):
    w1, b1, w2, b2, w3, b3 = params
    x = jnp.concatenate([state, action], axis=1)
    x = jnp.maximum(x @ w1 + b1, 0.0)
    x = jnp.maximum(x @ w2 + b2, 0.0)
    return x @ w3 + b3


if __name__ == "__main__":
    num_inputs, num_actions, hidden_size, batch = 8, 4, 32, 2

    key = jax.random.PRNGKey(0)
    kp, ks, ka = jax.random.split(key, 3)

    params = init_params(kp, num_inputs, num_actions, hidden_size)
    padded = pad_params(params, num_inputs, num_actions, hidden_size)

    state = jax.random.normal(ks, (batch, num_inputs), jnp.float32)
    action = jax.random.normal(ka, (batch, num_actions), jnp.float32)

    out = value_network_forward(state, action, padded)
    out = jax.block_until_ready(out)

    ref = reference_forward(state, action, params)
    assert out.shape == (batch, 1), out.shape
    assert jnp.allclose(out, ref, atol=1e-5, rtol=1e-5), (out, ref)

    print("KERNEL_OK")
</pallas_src>

<mosaic_0001>
module attributes {stable_mosaic.version = 11 : i64} {
  func.func @value_network_kernel(%arg0: i32, %arg1: memref<2x8xf32, #tpu.memory_space<vmem>>, %arg2: memref<2x4xf32, #tpu.memory_space<vmem>>, %arg3: memref<8x128xf32, #tpu.memory_space<vmem>>, %arg4: memref<4x128xf32, #tpu.memory_space<vmem>>, %arg5: memref<1x128xf32, #tpu.memory_space<vmem>>, %arg6: memref<128x128xf32, #tpu.memory_space<vmem>>, %arg7: memref<1x128xf32, #tpu.memory_space<vmem>>, %arg8: memref<1x128xf32, #tpu.memory_space<vmem>>, %arg9: memref<1x1xf32, #tpu.memory_space<vmem>>, %arg10: memref<2x128xf32, #tpu.memory_space<vmem>>) attributes {dimension_semantics = [#tpu.dimension_semantics<parallel>], iteration_bounds = array<i64: 1>, scalar_prefetch = 0 : i64, scratch_operands = 0 : i64, tpu.core_type = #tpu.core_type<tc>, window_params = [{transform_indices = @transform_0, window_bounds = array<i64: 2, 8>}, {transform_indices = @transform_1, window_bounds = array<i64: 2, 4>}, {pipeline_mode = #tpu.pipeline_mode<synchronous>, transform_indices = @transform_2, window_bounds = array<i64: 8, 128>}, {pipeline_mode = #tpu.pipeline_mode<synchronous>, transform_indices = @transform_3, window_bounds = array<i64: 4, 128>}, {pipeline_mode = #tpu.pipeline_mode<synchronous>, transform_indices = @transform_4, window_bounds = array<i64: 1, 128>}, {pipeline_mode = #tpu.pipeline_mode<synchronous>, transform_indices = @transform_5, window_bounds = array<i64: 128, 128>}, {pipeline_mode = #tpu.pipeline_mode<synchronous>, transform_indices = @transform_6, window_bounds = array<i64: 1, 128>}, {pipeline_mode = #tpu.pipeline_mode<synchronous>, transform_indices = @transform_7, window_bounds = array<i64: 1, 128>}, {pipeline_mode = #tpu.pipeline_mode<synchronous>, transform_indices = @transform_8, window_bounds = array<i64: 1, 1>}, {transform_indices = @transform_9, window_bounds = array<i64: 2, 128>}]} {
    %c0 = arith.constant 0 : index
    %c0_0 = arith.constant 0 : index
    %0 = vector.load %arg1[%c0, %c0_0] : memref<2x8xf32, #tpu.memory_space<vmem>>, vector<2x8xf32>
    %c0_1 = arith.constant 0 : index
    %c0_2 = arith.constant 0 : index
    %1 = vector.load %arg3[%c0_1, %c0_2] : memref<8x128xf32, #tpu.memory_space<vmem>>, vector<8x128xf32>
    %cst = arith.constant dense<0.000000e+00> : vector<2x128xf32>
    %2 = tpu.matmul %0, %1, %cst {dimension_numbers = #tpu.dot_dimension_numbers<[1], [0], [0], [1], [0, 0, 1, 1], [], []>} : vector<2x8xf32>, vector<8x128xf32>, vector<2x128xf32> -> vector<2x128xf32>
    %c0_3 = arith.constant 0 : index
    %c0_4 = arith.constant 0 : index
    %3 = vector.load %arg2[%c0_3, %c0_4] : memref<2x4xf32, #tpu.memory_space<vmem>>, vector<2x4xf32>
    %c0_5 = arith.constant 0 : index
    %c0_6 = arith.constant 0 : index
    %4 = vector.load %arg4[%c0_5, %c0_6] : memref<4x128xf32, #tpu.memory_space<vmem>>, vector<4x128xf32>
    %cst_7 = arith.constant dense<0.000000e+00> : vector<2x128xf32>
    %5 = tpu.matmul %3, %4, %cst_7 {dimension_numbers = #tpu.dot_dimension_numbers<[1], [0], [0], [1], [0, 0, 1, 1], [], []>} : vector<2x4xf32>, vector<4x128xf32>, vector<2x128xf32> -> vector<2x128xf32>
    %6 = arith.addf %2, %5 : vector<2x128xf32>
    %c0_8 = arith.constant 0 : index
    %c0_9 = arith.constant 0 : index
    %7 = vector.load %arg5[%c0_8, %c0_9] : memref<1x128xf32, #tpu.memory_space<vmem>>, vector<1x128xf32>
    %8 = vector.broadcast %7 : vector<1x128xf32> to vector<2x128xf32>
    %9 = arith.addf %6, %8 : vector<2x128xf32>
    %cst_10 = arith.constant 0.000000e+00 : f32
    %10 = vector.broadcast %cst_10 : f32 to vector<2x128xf32>
    %11 = arith.maximumf %9, %10 : vector<2x128xf32>
    %c0_11 = arith.constant 0 : index
    %c0_12 = arith.constant 0 : index
    %12 = vector.load %arg6[%c0_11, %c0_12] : memref<128x128xf32, #tpu.memory_space<vmem>>, vector<128x128xf32>
    %cst_13 = arith.constant dense<0.000000e+00> : vector<2x128xf32>
    %13 = tpu.matmul %11, %12, %cst_13 {dimension_numbers = #tpu.dot_dimension_numbers<[1], [0], [0], [1], [0, 0, 1, 1], [], []>} : vector<2x128xf32>, vector<128x128xf32>, vector<2x128xf32> -> vector<2x128xf32>
    %c0_14 = arith.constant 0 : index
    %c0_15 = arith.constant 0 : index
    %14 = vector.load %arg7[%c0_14, %c0_15] : memref<1x128xf32, #tpu.memory_space<vmem>>, vector<1x128xf32>
    %15 = vector.broadcast %14 : vector<1x128xf32> to vector<2x128xf32>
    %16 = arith.addf %13, %15 : vector<2x128xf32>
    %cst_16 = arith.constant 0.000000e+00 : f32
    %17 = vector.broadcast %cst_16 : f32 to vector<2x128xf32>
    %18 = arith.maximumf %16, %17 : vector<2x128xf32>
    %c0_17 = arith.constant 0 : index
    %c0_18 = arith.constant 0 : index
    %19 = vector.load %arg8[%c0_17, %c0_18] : memref<1x128xf32, #tpu.memory_space<vmem>>, vector<1x128xf32>
    %20 = vector.broadcast %19 : vector<1x128xf32> to vector<2x128xf32>
    %21 = arith.mulf %18, %20 : vector<2x128xf32>
    %cst_19 = arith.constant dense<0.000000e+00> : vector<2xf32>
    %22 = vector.multi_reduction <add>, %21, %cst_19 [1] : vector<2x128xf32> to vector<2xf32>
    %23 = vector.shape_cast %22 : vector<2xf32> to vector<2x1xf32>
    %c0_20 = arith.constant 0 : index
    %c0_21 = arith.constant 0 : index
    %24 = vector.load %arg9[%c0_20, %c0_21] : memref<1x1xf32, #tpu.memory_space<vmem>>, vector<1x1xf32>
    %25 = vector.broadcast %24 : vector<1x1xf32> to vector<2x1xf32>
    %26 = arith.addf %23, %25 : vector<2x1xf32>
    %27 = vector.shape_cast %26 : vector<2x1xf32> to vector<2x1xf32>
    %28 = vector.broadcast %27 : vector<2x1xf32> to vector<2x128xf32>
    %c0_22 = arith.constant 0 : index
    %c0_23 = arith.constant 0 : index
    %29 = vector.load %arg10[%c0_22, %c0_23] : memref<2x128xf32, #tpu.memory_space<vmem>>, vector<2x128xf32>
    tpu.vector_store %arg10[%c0_22, %c0_23], %28 {strides = array<i32>} : memref<2x128xf32, #tpu.memory_space<vmem>>, vector<2x128xf32>,
    return
  }
  func.func @transform_0(%arg0: i32) -> (i32, i32) {
    %c0_i32 = arith.constant 0 : i32
    %c0_i32_0 = arith.constant 0 : i32
    return %arg0, %c0_i32 : i32, i32
  }
  func.func @transform_1(%arg0: i32) -> (i32, i32) {
    %c0_i32 = arith.constant 0 : i32
    %c0_i32_0 = arith.constant 0 : i32
    return %arg0, %c0_i32 : i32, i32
  }
  func.func @transform_2(%arg0: i32) -> (i32, i32) {
    %c0_i32 = arith.constant 0 : i32
    %c0_i32_0 = arith.constant 0 : i32
    %c0_i32_1 = arith.constant 0 : i32
    return %c0_i32, %c0_i32_0 : i32, i32
  }
  func.func @transform_3(%arg0: i32) -> (i32, i32) {
    %c0_i32 = arith.constant 0 : i32
    %c0_i32_0 = arith.constant 0 : i32
    %c0_i32_1 = arith.constant 0 : i32
    return %c0_i32, %c0_i32_0 : i32, i32
  }
  func.func @transform_4(%arg0: i32) -> (i32, i32) {
    %c0_i32 = arith.constant 0 : i32
    %c0_i32_0 = arith.constant 0 : i32
    %c0_i32_1 = arith.constant 0 : i32
    return %c0_i32, %c0_i32_0 : i32, i32
  }
  func.func @transform_5(%arg0: i32) -> (i32, i32) {
    %c0_i32 = arith.constant 0 : i32
    %c0_i32_0 = arith.constant 0 : i32
    %c0_i32_1 = arith.constant 0 : i32
    return %c0_i32, %c0_i32_0 : i32, i32
  }
  func.func @transform_6(%arg0: i32) -> (i32, i32) {
    %c0_i32 = arith.constant 0 : i32
    %c0_i32_0 = arith.constant 0 : i32
    %c0_i32_1 = arith.constant 0 : i32
    return %c0_i32, %c0_i32_0 : i32, i32
  }
  func.func @transform_7(%arg0: i32) -> (i32, i32) {
    %c0_i32 = arith.constant 0 : i32
    %c0_i32_0 = arith.constant 0 : i32
    %c0_i32_1 = arith.constant 0 : i32
    return %c0_i32, %c0_i32_0 : i32, i32
  }
  func.func @transform_8(%arg0: i32) -> (i32, i32) {
    %c0_i32 = arith.constant 0 : i32
    %c0_i32_0 = arith.constant 0 : i32
    %c0_i32_1 = arith.constant 0 : i32
    return %c0_i32, %c0_i32_0 : i32, i32
  }
  func.func @transform_9(%arg0: i32) -> (i32, i32) {
    %c0_i32 = arith.constant 0 : i32
    %c0_i32_0 = arith.constant 0 : i32
    return %arg0, %c0_i32 : i32, i32
  }
}

</mosaic_0001>

<bundles_post_ra>
// kernel: tpu_custom_call.1
= control target key start
LH: loop header
LB: loop body
LE: loop exit
PB: predicated region body
PF: predicated region fallthrough
CT: control target
= control target key end

     0   :  { %s466_s0 = inlined_call_operand.hbm [shape: f32[2,8], index: 0, kind: input, shape index: {}]   ;;  %s467_s1 = inlined_call_operand.hbm [shape: f32[2,4], index: 1, kind: input, shape index: {}]   ;;  %s468_s2 = inlined_call_operand.hbm [shape: f32[8,128], index: 2, kind: input, shape index: {}]   ;;  %s469_s3 = inlined_call_operand.vmem [shape: f32[4,128], index: 3, kind: input, shape index: {}]   ;;  %s470_s4 = inlined_call_operand.vmem [shape: f32[1,128], index: 4, kind: input, shape index: {}]   ;;  %s471_s5 = inlined_call_operand.hbm [shape: f32[128,128], index: 5, kind: input, shape index: {}]   ;;  %s472_s6 = inlined_call_operand.vmem [shape: f32[1,128], index: 6, kind: input, shape index: {}]   ;;  %s473_s7 = inlined_call_operand.vmem [shape: f32[1,128], index: 7, kind: input, shape index: {}]   ;;  %s474_s8 = inlined_call_operand.<no memory space> [shape: f32[1,1], index: 8, kind: input, shape index: {}]   ;;  %s475_s9 = inlined_call_operand.hbm [shape: f32[2,128], index: 9, kind: output, shape index: {}]  }
   0x1   :  { %v14_v0 = vstv %s474_s8 }
   0x2   :  { %15 = vst [vmem:[#allocation2] sm:$0x1] %v14_v0 }
   0x3   :  { %16 = vsyncpa [#allocation4], 0 }
   0x4   :  { %17 = vsyncpa [#allocation7], 0 }
   0x5   :  { %18 = vsyncpa [#allocation10], 0  ;;  %s36_s13 = sshll.u32 %s467_s1, 4  ;;  %s37_s13 = int_to_ptr.hbm [resolvable:$true] %s36_s13 }
   0x6   :  { %19 = vsyncpa [#allocation5], 0  ;;  %s378_s14 = smov [#allocation6]   ;;  %s25_s18 = sshll.u32 %s466_s0, 4  ;;  %s26_s18 = int_to_ptr.hbm [resolvable:$true] %s25_s18 }
   0x7   :  { %s38_s15 = sshll.u32 %s378_s14, 4  ;;  %s379_s8 = smov [#allocation3]   ;;  %s39_s15 = int_to_ptr.vmem [resolvable:$true] %s38_s15 }
   0x8   :  { %41 = dma.hbm_to_vmem [thread:$0]  %s37_s13, 32, %s39_s15, [#allocation7]  }
   0x9   :  { %s27_s19 = sshll.u32 %s379_s8, 4  ;;  %s47_s22 = sshll.u32 %s468_s2, 4  ;;  %s28_s19 = int_to_ptr.vmem [resolvable:$true] %s27_s19  ;;  %s48_s22 = int_to_ptr.hbm [resolvable:$true] %s47_s22 }
   0xa   :  { %30 = dma.hbm_to_vmem [thread:$0]  %s26_s18, 32, %s28_s19, [#allocation4]  }
   0xb   :  { %s61_s24 = sshll.u32 %s471_s5, 4  ;;  %s380_s25 = smov [#allocation8]   ;;  %s62_s24 = int_to_ptr.hbm [resolvable:$true] %s61_s24 }
   0xc   :  { %s49_s26 = sshll.u32 %s380_s25, 4  ;;  %s381_s0 = smov [#allocation9]   ;;  %s50_s26 = int_to_ptr.vmem [resolvable:$true] %s49_s26 }
   0xd   :  { %52 = dma.hbm_to_vmem [thread:$0]  %s48_s22, 128, %s50_s26, [#allocation7]  }
   0xe   :  { %s63_s27 = sshll.u32 %s381_s0, 4  ;;  %s382_s28 = smov 128   ;;  %s64_s27 = int_to_ptr.vmem [resolvable:$true] %s63_s27 }
   0xf   :  { %s383_s29 = smov 8  }
  0x10   :  { %69 = dma.hbm_to_vmem [thread:$0]  %s62_s24, 2048, %s64_s27, [#allocation10], %s382_s28, %s382_s28, %s383_s29  }
  0x11   :  { %370 = dma.done.wait [#allocation4], 32  }
  0x12   :  { %371 = vsyncadd [#allocation4], 4294967264 }
  0x13   :  { %372 = dma.done.wait [#allocation7], 160  }
  0x14   :  { %373 = vsyncadd [#allocation7], 4294967136 }
  0x15   :  { %374 = dma.done.wait [#allocation10], 2048  }
  0x16   :  { %375 = vsyncadd [#allocation10], 4294965248  ;;  %vm100_vm0 = vcmask 1043456   ;;  %vm96_vm1 = vcmask 31744   ;;  %vm124_vm2 = vcmask 64512   ;;  %v93_v2 = vld [vmem:[#allocation8] sm:$0xff] }
  0x17   :  { %v95_v1 = vld [vmem:[%s469_s3] sm:$0xf]  ;;  %143 = vmatpush.msra.mxu1 %v93_v2  ;;  %v169_v5 = vld [vmem:[#allocation9 + $0x78] sm:$0xff]  ;;  %v167_v7 = vld [vmem:[#allocation9 + $0x68] sm:$0xff]  ;;  %vm200_vm3 = vcmask 1041408   ;;  %v384_v34 = vmov 0  }
  0x18   :  { %v94_v3 = vld [vmem:[#allocation6] sm:$0x3]  ;;  %234 = vmatpush.msk.msra.mxu0 %vm100_vm0, %v95_v1  ;;  %v92_v4 = vld [vmem:[#allocation3] sm:$0x3]  ;;  %174 = vmatpush.msra.mxu2 %v169_v5  ;;  %v166_v8 = vld [vmem:[#allocation9 + $0x60] sm:$0xff]  ;;  %s222_s16 = sshll.u32 %s475_s9, 4  ;;  %s223_s16 = int_to_ptr.hbm [resolvable:$true] %s222_s16 }
  0x19   :  { %235 = vmatmul.msk.f32.vlgmr.msra.gmra.mxu0 %vm96_vm1, %v94_v3  ;;  %236 = vmatmul.msk.f32.vlgmr.msra.gmra.mxu1 %vm124_vm2, %v92_v4  ;;  %v168_v6 = vld [vmem:[#allocation9 + $0x70] sm:$0xff]  ;;  %v165_v9 = vld [vmem:[#allocation9 + $0x58] sm:$0xff]  ;;  %v163_v11 = vld [vmem:[#allocation9 + $0x48] sm:$0xff] }
  0x1a   :  { %175 = vmatpush.msra.mxu2 %v168_v6  ;;  %v164_v10 = vld [vmem:[#allocation9 + $0x50] sm:$0xff]  ;;  %v162_v12 = vld [vmem:[#allocation9 + $0x40] sm:$0xff]  ;;  %v161_v13 = vld [vmem:[#allocation9 + $0x38] sm:$0xff]  ;;  %245 = vset.pattern.permute.xlu0 %v384_v34 }
  0x1b   :  { %v160_v14 = vld [vmem:[#allocation9 + $0x30] sm:$0xff]  ;;  %v159_v15 = vld [vmem:[#allocation9 + $0x28] sm:$0xff]  ;;  %v158_v16 = vld [vmem:[#allocation9 + $0x20] sm:$0xff] }
  0x1c   :  { %176 = vmatpush.msra.mxu2 %v167_v7  ;;  %v157_v17 = vld [vmem:[#allocation9 + $0x18] sm:$0xff]  ;;  %v156_v18 = vld [vmem:[#allocation9 + $0x10] sm:$0xff]  ;;  %v155_v19 = vld [vmem:[#allocation9 + $0x8] sm:$0xff] }
  0x1d   :  { %v154_v20 = vld [vmem:[#allocation9] sm:$0xff]  ;;  %v246_v21 = vld [vmem:[%s470_s4] ss:$0 sm:$0xff]  ;;  %s385_s4 = smov [#allocation11]  }
  0x1e   :  { %177 = vmatpush.msra.mxu2 %v166_v8  ;;  %v247_v27 = vld [vmem:[%s472_s6] ss:$0 sm:$0xff]  ;;  %s220_s14 = sshll.u32 %s385_s4, 4  ;;  %s221_s14 = int_to_ptr.vmem [resolvable:$true] %s220_s14 }
  0x1f   :  { %v248_v30 = vld [vmem:[%s473_s7] ss:$0 sm:$0xff] }
  0x20   :  { %178 = vmatpush.msra.mxu2 %v165_v9  ;;  %v249_v35 = vld [vmem:[#allocation2] ss:$0 sm:$0xff] }
  0x22   :  { %179 = vmatpush.msra.mxu2 %v164_v10 }
  0x24   :  { %180 = vmatpush.msra.mxu2 %v163_v11 }
  0x26   :  { %181 = vmatpush.msra.mxu2 %v162_v12 }
  0x28   :  { %182 = vmatpush.msra.mxu2 %v161_v13 }
  0x2a   :  { %183 = vmatpush.msra.mxu2 %v160_v14 }
  0x2c   :  { %184 = vmatpush.msra.mxu2 %v159_v15 }
  0x2e   :  { %185 = vmatpush.msra.mxu2 %v158_v16 }
  0x30   :  { %186 = vmatpush.msra.mxu2 %v157_v17 }
  0x32   :  { %187 = vmatpush.msra.mxu2 %v156_v18 }
  0x34   :  { %188 = vmatpush.msra.mxu2 %v155_v19 }
  0x36   :  { %189 = vmatpush.msra.mxu2 %v154_v20 }
  0x96   :  { %v121_v22 = vpop.f32.mrf.mxu0  ;;  %v145_v23 = vpop.f32.mrf.mxu1 }
  0x97   :  { %v146_v24 = vadd.f32 %v145_v23, %v121_v22 }
  0x99   :  { %v152_v25 = vadd.f32 %v246_v21, %v146_v24 }
  0x9b   :  { %v153_v26 = vmax.f32 %v152_v25, 0.0 }
  0x9d   :  { %190 = vmatmul.f32.vlgmr.msra.gmra.mxu2 %v153_v26 }
 0x120   :  { %v191_v28 = vpop.f32.mrf.mxu2 }
 0x121   :  { %v192_v29 = vadd.f32 %v247_v27, %v191_v28 }
 0x123   :  { %v194_v31 = vmax.f32 %v192_v29, 0.0 }
 0x125   :  { %v199_v32 = vmul.f32 %v248_v30, %v194_v31 }
 0x127   :  { %v201_v33 = vsel %vm200_vm3, %v199_v32, 0.0 }
 0x128   :  { %202 = vadd.xlane.f32.xlu0 %v201_v33 }
 0x19b   :  { %v203_v36 = vpop.xlane.xlu0 %202 }
 0x19c   :  { %v208_v37 = vadd.f32 %v249_v35, %v203_v36 }
 0x19e   :  { %211 = vperm.xlu0 %245, %v208_v37  }
 0x210   :  { %v212_v38 = vpop.permute.xlu0 %211 }
 0x211   :  { %214 = vst [vmem:[#allocation11] sm:$0x3] %v212_v38 }
 0x212   :  { %225 = dma.vmem_to_hbm [thread:$0]  %s221_s14, 32, %s223_s16, [#allocation5]  }
 0x213   :  { %376 = dma.done.wait [#allocation5], 32  }
 0x214   :  { %377 = vsyncadd [#allocation5], 4294967264 }
 0x215   :  { %230 = vsyncpa [#allocation4], 1 }
 0x216   :  { %231 = vsyncpa [#allocation7], 1 }
 0x217   :  { %232 = vsyncpa [#allocation10], 1 }
 0x218   :  { %233 = vsyncpa [#allocation5], 1 }

</bundles_post_ra>
